<compile_context>
chip_gen: v6e
topology: v6e:2x2x1
jax: 0.10.0
libtpu: 0.0.40
codegen_flags: <defaults>
</compile_context>

<pallas_src>
import functools

import jax
import jax.numpy as jnp
from jax.experimental import pallas as pl
from jax.experimental.pallas import tpu as pltpu


def _mlp_kernel(x_ref, w1_ref, b1_ref, w2_ref, b2_ref, o_ref):
    """One (batch, spatial-tile) block of the 1x1-conv MLP.

    x_ref : (1, C_in,  tile_p)   activations, spatial positions on lanes
    w1_ref: (C_hid, C_in)        fc1 weight in PyTorch conv layout [out, in]
    b1_ref: (C_hid, 1)
    w2_ref: (C_out, C_hid)       fc2 weight [out, in]
    b2_ref: (C_out, 1)
    o_ref : (1, C_out, tile_p)
    """
    x = x_ref[0]                                              # (C_in, tile_p)
    # fc1: (C_hid, C_in) @ (C_in, tile_p) -> (C_hid, tile_p), f32 accumulate.
    h = jnp.dot(w1_ref[...], x, preferred_element_type=jnp.float32)
    h = jnp.maximum(h + b1_ref[...], 0.0)                     # bias + ReLU in f32
    # fc2: (C_out, C_hid) @ (C_hid, tile_p) -> (C_out, tile_p), lane-dense out.
    o = jnp.dot(w2_ref[...], h.astype(w2_ref.dtype),
                preferred_element_type=jnp.float32)
    o_ref[0] = (o + b2_ref[...]).astype(o_ref.dtype)


@functools.partial(jax.jit, static_argnames=("tile_p_cap",))
def mlp_pallas(x_nchw, w1, b1, w2, b2, *, tile_p_cap=2048):
    """x_nchw: [B, C_in, H, W]; w1: [C_hid, C_in]; b1: [C_hid];
    w2: [C_out, C_hid]; b2: [C_out].  Weights are in PyTorch Conv2d(1x1)
    layout with the trailing 1x1 kernel dims squeezed."""
    B, C_in, H, W = x_nchw.shape
    C_hid = w1.shape[0]
    C_out = w2.shape[0]
    HW = H * W

    # Spatial tile: 128-aligned (lane-dense), as large as reasonable.
    # Per-step VMEM footprint is roughly
    #   2*tile_p*C_in*4 (x, dbl-buf) + 2*tile_p*C_out*4 (out, dbl-buf)
    #   + tile_p*C_hid*4 (hidden) + resident weights
    # which is well under the 32 MiB scoped default for these channel widths,
    # including on v7x's 64 MiB VMEM.
    tile_p = min(tile_p_cap, pl.cdiv(HW, 128) * 128)
    hw_pad = pl.cdiv(HW, tile_p) * tile_p

    x_flat = x_nchw.reshape(B, C_in, HW)
    if hw_pad != HW:
        x_flat = jnp.pad(x_flat, ((0, 0), (0, 0), (0, hw_pad - HW)))

    b1_2d = b1.reshape(C_hid, 1)
    b2_2d = b2.reshape(C_out, 1)

    out_flat = pl.pallas_call(
        _mlp_kernel,
        out_shape=jax.ShapeDtypeStruct((B, C_out, hw_pad), x_nchw.dtype),
        grid_spec=pltpu.PrefetchScalarGridSpec(
            num_scalar_prefetch=0,
            grid=(B, hw_pad // tile_p),
            in_specs=[
                pl.BlockSpec((1, C_in, tile_p), lambda b, p: (b, 0, p)),
                pl.BlockSpec((C_hid, C_in), lambda b, p: (0, 0)),
                pl.BlockSpec((C_hid, 1), lambda b, p: (0, 0)),
                pl.BlockSpec((C_out, C_hid), lambda b, p: (0, 0)),
                pl.BlockSpec((C_out, 1), lambda b, p: (0, 0)),
            ],
            out_specs=pl.BlockSpec((1, C_out, tile_p), lambda b, p: (b, 0, p)),
        ),
        compiler_params=pltpu.CompilerParams(
            dimension_semantics=("parallel", "parallel")),
    )(x_flat, w1, b1_2d, w2, b2_2d)

    if hw_pad != HW:
        out_flat = out_flat[:, :, :HW]
    return out_flat.reshape(B, C_out, H, W)


def _reference(x_nchw, w1, b1, w2, b2):
    # Pure-JAX reference of the PyTorch forward (1x1 convs == channel matmuls).
    h = jnp.einsum("oc,bchw->bohw", w1, x_nchw) + b1[None, :, None, None]
    h = jnp.maximum(h, 0.0)
    return jnp.einsum("oc,bchw->bohw", w2, h) + b2[None, :, None, None]


if __name__ == "__main__":
    # Small shapes consistent with the module: B=2, C_in=4, H=W=16, hidden=32.
    B, C_in, H, W = 2, 4, 16, 16
    C_hid, C_out = 32, C_in

    key = jax.random.PRNGKey(0)
    kx, k1, kb1, k2, kb2 = jax.random.split(key, 5)

    x = jax.random.normal(kx, (B, C_in, H, W), dtype=jnp.float32)
    # Conv2d 1x1 weights in PyTorch layout [C_out, C_in] (1x1 kernel squeezed).
    w1 = jax.random.normal(k1, (C_hid, C_in), dtype=jnp.float32) * 0.1
    b1 = jax.random.normal(kb1, (C_hid,), dtype=jnp.float32) * 0.1
    w2 = jax.random.normal(k2, (C_out, C_hid), dtype=jnp.float32) * 0.1
    b2 = jax.random.normal(kb2, (C_out,), dtype=jnp.float32) * 0.1

    out = mlp_pallas(x, w1, b1, w2, b2)
    out = jax.block_until_ready(out)

    ref = _reference(x, w1, b1, w2, b2)
    assert out.shape == (B, C_out, H, W)
    assert jnp.allclose(out, ref, atol=1e-5, rtol=1e-5), "mismatch vs reference"

    print("KERNEL_OK")
</pallas_src>

<mosaic_0001>
module attributes {stable_mosaic.version = 11 : i64} {
  func.func @_mlp_kernel(%arg0: i32, %arg1: i32, %arg2: memref<1x4x256xf32, #tpu.memory_space<vmem>>, %arg3: memref<32x4xf32, #tpu.memory_space<vmem>>, %arg4: memref<32x1xf32, #tpu.memory_space<vmem>>, %arg5: memref<4x32xf32, #tpu.memory_space<vmem>>, %arg6: memref<4x1xf32, #tpu.memory_space<vmem>>, %arg7: memref<1x4x256xf32, #tpu.memory_space<vmem>>) attributes {dimension_semantics = [#tpu.dimension_semantics<parallel>, #tpu.dimension_semantics<parallel>], iteration_bounds = array<i64: 2, 1>, scalar_prefetch = 0 : i64, scratch_operands = 0 : i64, tpu.core_type = #tpu.core_type<tc>, window_params = [{transform_indices = @transform_0, window_bounds = array<i64: 1, 4, 256>}, {pipeline_mode = #tpu.pipeline_mode<synchronous>, transform_indices = @transform_1, window_bounds = array<i64: 32, 4>}, {pipeline_mode = #tpu.pipeline_mode<synchronous>, transform_indices = @transform_2, window_bounds = array<i64: 32, 1>}, {pipeline_mode = #tpu.pipeline_mode<synchronous>, transform_indices = @transform_3, window_bounds = array<i64: 4, 32>}, {pipeline_mode = #tpu.pipeline_mode<synchronous>, transform_indices = @transform_4, window_bounds = array<i64: 4, 1>}, {transform_indices = @transform_5, window_bounds = array<i64: 1, 4, 256>}]} {
    %c0 = arith.constant 0 : index
    %c0_0 = arith.constant 0 : index
    %c0_1 = arith.constant 0 : index
    %0 = vector.load %arg2[%c0, %c0_0, %c0_1] : memref<1x4x256xf32, #tpu.memory_space<vmem>>, vector<1x4x256xf32>
    %1 = vector.shape_cast %0 : vector<1x4x256xf32> to vector<4x256xf32>
    %c0_2 = arith.constant 0 : index
    %c0_3 = arith.constant 0 : index
    %2 = vector.load %arg3[%c0_2, %c0_3] : memref<32x4xf32, #tpu.memory_space<vmem>>, vector<32x4xf32>
    %cst = arith.constant dense<0.000000e+00> : vector<32x256xf32>
    %3 = tpu.matmul %2, %1, %cst {dimension_numbers = #tpu.dot_dimension_numbers<[1], [0], [0], [1], [0, 0, 1, 1], [], []>} : vector<32x4xf32>, vector<4x256xf32>, vector<32x256xf32> -> vector<32x256xf32>
    %c0_4 = arith.constant 0 : index
    %c0_5 = arith.constant 0 : index
    %4 = vector.load %arg4[%c0_4, %c0_5] : memref<32x1xf32, #tpu.memory_space<vmem>>, vector<32x1xf32>
    %5 = vector.broadcast %4 : vector<32x1xf32> to vector<32x256xf32>
    %6 = arith.addf %3, %5 : vector<32x256xf32>
    %cst_6 = arith.constant 0.000000e+00 : f32
    %7 = vector.broadcast %cst_6 : f32 to vector<32x256xf32>
    %8 = arith.maximumf %6, %7 : vector<32x256xf32>
    %c0_7 = arith.constant 0 : index
    %c0_8 = arith.constant 0 : index
    %9 = vector.load %arg5[%c0_7, %c0_8] : memref<4x32xf32, #tpu.memory_space<vmem>>, vector<4x32xf32>
    %cst_9 = arith.constant dense<0.000000e+00> : vector<4x256xf32>
    %10 = tpu.matmul %9, %8, %cst_9 {dimension_numbers = #tpu.dot_dimension_numbers<[1], [0], [0], [1], [0, 0, 1, 1], [], []>} : vector<4x32xf32>, vector<32x256xf32>, vector<4x256xf32> -> vector<4x256xf32>
    %c0_10 = arith.constant 0 : index
    %c0_11 = arith.constant 0 : index
    %11 = vector.load %arg6[%c0_10, %c0_11] : memref<4x1xf32, #tpu.memory_space<vmem>>, vector<4x1xf32>
    %12 = vector.broadcast %11 : vector<4x1xf32> to vector<4x256xf32>
    %13 = arith.addf %10, %12 : vector<4x256xf32>
    %c0_12 = arith.constant 0 : index
    %c0_13 = arith.constant 0 : index
    %c0_14 = arith.constant 0 : index
    %14 = vector.load %arg7[%c0_12, %c0_13, %c0_14] : memref<1x4x256xf32, #tpu.memory_space<vmem>>, vector<1x4x256xf32>
    %15 = vector.shape_cast %14 : vector<1x4x256xf32> to vector<4x256xf32>
    %16 = vector.shape_cast %13 : vector<4x256xf32> to vector<1x4x256xf32>
    tpu.vector_store %arg7[%c0_12, %c0_13, %c0_14], %16 {strides = array<i32>} : memref<1x4x256xf32, #tpu.memory_space<vmem>>, vector<1x4x256xf32>,
    return
  }
  func.func @transform_0(%arg0: i32, %arg1: i32) -> (i32, i32, i32) {
    %c0_i32 = arith.constant 0 : i32
    %c0_i32_0 = arith.constant 0 : i32
    return %arg0, %c0_i32, %arg1 : i32, i32, i32
  }
  func.func @transform_1(%arg0: i32, %arg1: i32) -> (i32, i32) {
    %c0_i32 = arith.constant 0 : i32
    %c0_i32_0 = arith.constant 0 : i32
    %c0_i32_1 = arith.constant 0 : i32
    return %c0_i32, %c0_i32_0 : i32, i32
  }
  func.func @transform_2(%arg0: i32, %arg1: i32) -> (i32, i32) {
    %c0_i32 = arith.constant 0 : i32
    %c0_i32_0 = arith.constant 0 : i32
    %c0_i32_1 = arith.constant 0 : i32
    return %c0_i32, %c0_i32_0 : i32, i32
  }
  func.func @transform_3(%arg0: i32, %arg1: i32) -> (i32, i32) {
    %c0_i32 = arith.constant 0 : i32
    %c0_i32_0 = arith.constant 0 : i32
    %c0_i32_1 = arith.constant 0 : i32
    return %c0_i32, %c0_i32_0 : i32, i32
  }
  func.func @transform_4(%arg0: i32, %arg1: i32) -> (i32, i32) {
    %c0_i32 = arith.constant 0 : i32
    %c0_i32_0 = arith.constant 0 : i32
    %c0_i32_1 = arith.constant 0 : i32
    return %c0_i32, %c0_i32_0 : i32, i32
  }
  func.func @transform_5(%arg0: i32, %arg1: i32) -> (i32, i32, i32) {
    %c0_i32 = arith.constant 0 : i32
    %c0_i32_0 = arith.constant 0 : i32
    return %arg0, %c0_i32, %arg1 : i32, i32, i32
  }
}

</mosaic_0001>

<bundles_post_ra>
// kernel: mlp_pallas.1
= control target key start
LH: loop header
LB: loop body
LE: loop exit
PB: predicated region body
PF: predicated region fallthrough
CT: control target
= control target key end

     0   :  { %s689_s18 = smov 0   ;;  %s691_s19 = smov 0   ;;  %s759_s0 = inlined_call_operand.vmem [shape: f32[2,4,256], index: 0, kind: input, shape index: {}]   ;;  %s760_s1 = inlined_call_operand.vmem [shape: f32[32,4], index: 1, kind: input, shape index: {}]   ;;  %s761_s2 = inlined_call_operand.vmem [shape: f32[32,1], index: 2, kind: input, shape index: {}]   ;;  %s762_s3 = inlined_call_operand.vmem [shape: f32[4,32], index: 3, kind: input, shape index: {}]   ;;  %s763_s4 = inlined_call_operand.vmem [shape: f32[4,1], index: 4, kind: input, shape index: {}]   ;;  %s764_s5 = inlined_call_operand.vmem [shape: f32[2,4,256], index: 5, kind: output, shape index: {}]  }
   0x1   :  { %s693_s20 = smov 0  }
   0x2 LB: > { %s27_s21 = sadd.s32 1, %s651_s19  ;;  %p588_p0 = scmp.ge.s32.totalorder %s655_s20, 1  ;;  %s655_s20 = sphi %s693_s20, %s15_s20   ;;  %s651_s19 = sphi %s691_s19, %s766_s19   ;;  %s647_s18 = sphi %s689_s18, %s765_s18  }
   0x3   : > { %p29_p1 = scmp.ge.s32.totalorder %s27_s21, 2  ;;  %p208_p2 = scmp.lt.s32.totalorder %s655_s20, 3 }
   0x5   : > { %s768_s21 = smov (%p29_p1, %s27_s21), 0  ;;  %p209_p3 = pnand %p588_p0, %p208_p2 }
   0x6   : > { %p245_p4 = scmp.lt.s32.totalorder (!%p209_p3), %s647_s18, 1 }
   0x7   : > { %212 = sbr.rel (%p209_p3) target bundleno = 440 (0x1b8), region = 40 }
   0xc   : > { %v657_v0 = vmov 0.0   ;;  %v270_v1 = vld [vmem:[%s761_s2 + $0x8] sm:$0xff]  ;;  %s770_s18 = smov (!%p245_p4, %s647_s18), 1  ;;  %v658_v2 = vmov 0   ;;  %v272_v3 = vld [vmem:[%s761_s2 + $0x18] sm:$0xff]  ;;  %v269_v4 = vld [vmem:[%s761_s2] sm:$0xff] }
   0xd   : > { %377 = vmatprep.mubr.f32.mxu0 %v657_v0  ;;  %485 = vmatprep.mubr.f32.mxu1 %v657_v0  ;;  %s602_s26 = sshll.u32 %s770_s18, 3  ;;  %v271_v5 = vld [vmem:[%s761_s2 + $0x10] sm:$0xff]  ;;  %vm308_vm0 = vcmask 1043456   ;;  %v265_v8 = vld [vmem:[%s760_s1] sm:$0xff]  ;;  %vm295_vm1 = vcmask 31744   ;;  %v266_v10 = vld [vmem:[%s760_s1 + $0x8] sm:$0xff] }
   0xe   : > { %631 = vset.pattern.permute.xlu1 %v658_v2  ;;  %630 = vset.pattern.permute.xlu0 %v658_v2  ;;  %s252_s8 = scalar_lea.vmem %s759_s0, %s602_s26  ;;  %v411_v9 = vld [vmem:[%s763_s4] sm:$0xf]  ;;  %v267_v11 = vld [vmem:[%s760_s1 + $0x10] sm:$0xff]  ;;  %v268_v12 = vld [vmem:[%s760_s1 + $0x18] sm:$0xff]  ;;  %vm417_vm2 = vcmask 261120   ;;  %s262_s28 = scalar_lea.vmem %s764_s5, %s602_s26 }
   0xf   : > { %280 = vperm.xlu1 %631, %v270_v1   ;;  %290 = vperm.xlu0 %630, %v272_v3   ;;  %v264_v6 = vld [vmem:[%s252_s8] sm:$0xff] }
  0x10   : > { %v294_v7 = vcombine.high %v264_v6, %v264_v6  ;;  %v410_v41 = vld [vmem:[%s762_s3] sm:$0xf] }
  0x12   : > { %593 = vmatprep.subr.msk.mxu0 %vm308_vm0, %v294_v7 }
  0x13   : > { %275 = vperm.xlu1 %631, %v269_v4   ;;  %285 = vperm.xlu0 %630, %v271_v5  }
  0x14   : > { %594 = vmatpush1.msk.msra.mxu0 %vm308_vm0, %v264_v6 }
  0x15   : > { %595 = vmatmul.mubr.msk.f32.vlgmr.msra.gmra.mxu0 %vm295_vm1, %v265_v8 }
  0x16   : > { %383 = vmatprep.mubr.f32.mxu0 %v657_v0 }
  0x17   : > { %414 = vperm.xlu0 %630, %v411_v9  }
  0x19   : > { %596 = vmatmul.mubr.msk.f32.gmra.mxu0 %vm295_vm1, %v266_v10 }
  0x1a   : > { %389 = vmatprep.mubr.f32.mxu0 %v657_v0 }
  0x1d   : > { %597 = vmatmul.mubr.msk.f32.gmra.mxu0 %vm295_vm1, %v267_v11 }
  0x1e   : > { %395 = vmatprep.mubr.f32.mxu0 %v657_v0 }
  0x21   : > { %598 = vmatmul.mubr.msk.f32.gmra.mxu0 %vm295_vm1, %v268_v12 }
  0x8a   : > { %v291_v17 = vpop.permute.xlu0 %290  ;;  %v281_v20 = vpop.permute.xlu1 %280 }
  0x8e   : > { %v286_v22 = vpop.permute.xlu0 %285  ;;  %v276_v28 = vpop.permute.xlu1 %275 }
  0x92   : > { %v415_v43 = vpop.permute.xlu0 %414 }
  0xd5   : > { %v379_v13 = vpop.f32.mrf.mxu0 }
  0xd6   : > { %v380_v35 = vadd.f32 %v379_v13, %v276_v28 }
  0xd7   : > { %v381_v14 = vpop.f32.mrf.mxu0 }
  0xd8   : > { %v382_v33 = vadd.f32 %v381_v14, %v276_v28  ;;  %v402_v40 = vmax.f32 %v380_v35, 0.0 }
  0xd9   : > { %v385_v15 = vpop.f32.mrf.mxu0 }
  0xda   : > { %v386_v31 = vadd.f32 %v385_v15, %v281_v20  ;;  %v403_v39 = vmax.f32 %v382_v33, 0.0 }
  0xdb   : > { %v387_v16 = vpop.f32.mrf.mxu0 }
  0xdc   : > { %v388_v29 = vadd.f32 %v387_v16, %v281_v20  ;;  %v404_v38 = vmax.f32 %v386_v31, 0.0 }
  0xdd   : > { %v391_v18 = vpop.f32.mrf.mxu0 }
  0xde   : > { %v392_v27 = vadd.f32 %v391_v18, %v286_v22  ;;  %v405_v37 = vmax.f32 %v388_v29, 0.0 }
  0xdf   : > { %v393_v19 = vpop.f32.mrf.mxu0 }
  0xe0   : > { %v394_v25 = vadd.f32 %v393_v19, %v286_v22  ;;  %v406_v36 = vmax.f32 %v392_v27, 0.0 }
  0xe1   : > { %v397_v21 = vpop.f32.mrf.mxu0 }
  0xe2   : > { %v398_v23 = vadd.f32 %v397_v21, %v291_v17  ;;  %v407_v34 = vmax.f32 %v394_v25, 0.0 }
  0xe3   : > { %v399_v24 = vpop.f32.mrf.mxu0 }
  0xe4   : > { %v400_v26 = vadd.f32 %v399_v24, %v291_v17  ;;  %v408_v32 = vmax.f32 %v398_v23, 0.0 }
  0xe6   : > { %v409_v30 = vmax.f32 %v400_v26, 0.0 }
  0xe8   : > { %445 = vmatprep.subr.mxu1 %v409_v30 }
  0xe9   : > { %446 = vmatpush1.msra.mxu1 %v408_v32 }
  0xea   : > { %447 = vmatprep.subr.mxu1 %v407_v34 }
  0xeb   : > { %448 = vmatpush1.msra.mxu1 %v406_v36 }
  0xec   : > { %449 = vmatprep.subr.mxu1 %v405_v37 }
  0xed   : > { %450 = vmatpush1.msra.mxu1 %v404_v38 }
  0xee   : > { %451 = vmatprep.subr.mxu1 %v403_v39 }
  0xef   : > { %452 = vmatpush1.msra.mxu1 %v402_v40 }
  0xf0   : > { %599 = vmatmul.mubr.msk.f32.vlgmr.msra.gmra.mxu1 %vm417_vm2, %v410_v41 }
 0x1b0   : > { %v487_v42 = vpop.f32.mrf.mxu1 }
 0x1b1   : > { %v488_v45 = vadd.f32 %v487_v42, %v415_v43 }
 0x1b2   : > { %v489_v44 = vpop.f32.mrf.mxu1 }
 0x1b3   : > { %v490_v46 = vadd.f32 %v489_v44, %v415_v43 }
 0x1b5   : > { %v494_v47 = vcombine.low %v488_v45, %v490_v46 }
 0x1b7   : > { %496 = vst [vmem:[%s262_s28] sm:$0xff] %v494_v47 }
 0x1b8 PF: > { %s15_s20 = sadd.s32 1, %s655_s20   ;;  %s765_s18 = smov %s651_s19 }
 0x1b9   : > { %p12_p5 = scmp.ge.s32.totalorder %s15_s20, 4   ;;  %s766_s19 = smov %s768_s21 }
 0x1bb   :  { %14 = sbr.rel (!%p12_p5) target bundleno = 2 (0x2), region = 70 }

</bundles_post_ra>
